<compile_context>
chip_gen: v5e
topology: v5e:2x2
jax: 0.10.0
libtpu: 0.0.40
codegen_flags: <defaults>
</compile_context>

<pallas_src>
import jax
import jax.numpy as jnp
from jax.experimental import pallas as pl
from jax.experimental.pallas import tpu as pltpu


def identity_kernel(x_ref, o_ref):
    # Pure pass-through: one whole-tile load, one whole-tile store.
    o_ref[...] = x_ref[...]


def _lane_dense_2d(n):
    """Pick a (rows, cols) view with cols a multiple of 128 when possible."""
    for c in (512, 256, 128):
        if n % c == 0:
            return n // c, c
    return 1, n  # small / odd sizes: single row, whole-array block


def identity(x, *, row_tile=1024):
    """Pallas implementation of nn.Identity: returns a copy of `x`."""
    if x.size == 0:
        return x  # nothing to launch for an empty tensor

    orig_shape = x.shape
    rows, cols = _lane_dense_2d(x.size)
    x2 = x.reshape(rows, cols)  # free view of a contiguous array

    if rows <= row_tile:
        # Gridless: whole array is one VMEM block, single kernel invocation.
        out2 = pl.pallas_call(
            identity_kernel,
            out_shape=jax.ShapeDtypeStruct((rows, cols), x.dtype),
            in_specs=[pl.BlockSpec(memory_space=pltpu.VMEM)],
            out_specs=pl.BlockSpec(memory_space=pltpu.VMEM),
        )(x2)
    else:
        # Large inputs: tile along rows, mark the axis parallel so megacore /
        # dual-TC chips (v7x) can split the copy.
        out2 = pl.pallas_call(
            identity_kernel,
            out_shape=jax.ShapeDtypeStruct((rows, cols), x.dtype),
            grid=(pl.cdiv(rows, row_tile),),
            in_specs=[pl.BlockSpec((row_tile, cols), lambda i: (i, 0))],
            out_specs=pl.BlockSpec((row_tile, cols), lambda i: (i, 0)),
            compiler_params=pltpu.CompilerParams(
                dimension_semantics=("parallel",)),
        )(x2)

    return out2.reshape(orig_shape)


if __name__ == "__main__":
    key = jax.random.PRNGKey(0)

    # Small shape consistent with a generic feature map: (B, C, H, W).
    x = jax.random.normal(key, (2, 4, 16, 16), dtype=jnp.float32)

    out = identity(x)
    jax.block_until_ready(out)

    assert out.shape == x.shape, (out.shape, x.shape)
    assert out.dtype == x.dtype, (out.dtype, x.dtype)
    assert jnp.array_equal(out, x), float(jnp.max(jnp.abs(out - x)))

    print("KERNEL_OK")
</pallas_src>

<mosaic_0001>
module attributes {stable_mosaic.version = 11 : i64} {
  func.func @identity_kernel(%arg0: memref<4x512xf32, #tpu.memory_space<vmem>>, %arg1: memref<4x512xf32, #tpu.memory_space<vmem>>) attributes {dimension_semantics = [], scalar_prefetch = 0 : i64, scratch_operands = 0 : i64, tpu.core_type = #tpu.core_type<tc>} {
    %c0 = arith.constant 0 : index
    %c0_0 = arith.constant 0 : index
    %0 = vector.load %arg0[%c0, %c0_0] : memref<4x512xf32, #tpu.memory_space<vmem>>, vector<4x512xf32>
    %c0_1 = arith.constant 0 : index
    %c0_2 = arith.constant 0 : index
    %1 = vector.load %arg1[%c0_1, %c0_2] : memref<4x512xf32, #tpu.memory_space<vmem>>, vector<4x512xf32>
    tpu.vector_store %arg1[%c0_1, %c0_2], %0 {strides = array<i32>} : memref<4x512xf32, #tpu.memory_space<vmem>>, vector<4x512xf32>,
    return
  }
}

</mosaic_0001>

<bundles_post_ra>
// kernel: tpu_custom_call.1
= control target key start
LH: loop header
LB: loop body
LE: loop exit
PB: predicated region body
PF: predicated region fallthrough
CT: control target
= control target key end

     0   :  { %6 = vsyncpa [#allocation3], 0  ;;  %s116_s0 = inlined_call_operand.hbm [shape: f32[4,512], index: 0, kind: input, shape index: {}]   ;;  %s117_s1 = inlined_call_operand.hbm [shape: f32[4,512], index: 1, kind: output, shape index: {}]  }
   0x1   :  { %7 = vsyncpa [#allocation4], 0  ;;  %s13_s8 = sshll.u32 %s116_s0, 4  ;;  %s98_s9 = smov [#allocation2]   ;;  %s14_s8 = int_to_ptr.hbm [resolvable:$true] %s13_s8 }
   0x2   :  { %s15_s10 = sshll.u32 %s98_s9, 4  ;;  %s16_s10 = int_to_ptr.vmem [resolvable:$true] %s15_s10 }
   0x3   :  { %18 = dma.hbm_to_vmem [thread:$0]  %s14_s8, 256, %s16_s10, [#allocation3]  }
   0x4   :  { %94 = dma.done.wait [#allocation3], 256  }
   0x5   :  { %95 = vsyncadd [#allocation3], 4294967040  ;;  %s99_s11 = smov [#allocation5]   ;;  %s34_s15 = sshll.u32 %s117_s1, 4  ;;  %v23_v0 = vld [vmem:[#allocation2] sm:$0xff]  ;;  %v24_v1 = vld [vmem:[#allocation2 + $0x8] sm:$0xff]  ;;  %s35_s15 = int_to_ptr.hbm [resolvable:$true] %s34_s15 }
   0x6   :  { %s32_s12 = sshll.u32 %s99_s11, 4  ;;  %25 = vst [vmem:[#allocation5] sm:$0xff] %v23_v0  ;;  %s33_s12 = int_to_ptr.vmem [resolvable:$true] %s32_s12 }
   0x7   :  { %26 = vst [vmem:[#allocation5 + $0x8] sm:$0xff] %v24_v1 }
   0x8   :  { %37 = dma.vmem_to_hbm [thread:$0]  %s33_s12, 256, %s35_s15, [#allocation4]  }
   0x9   :  { %96 = dma.done.wait [#allocation4], 256  }
   0xa   :  { %97 = vsyncadd [#allocation4], 4294967040 }
   0xb   :  { %42 = vsyncpa [#allocation3], 1 }
   0xc   :  { %43 = vsyncpa [#allocation4], 1 }

</bundles_post_ra>
